<compile_context>
chip_gen: v7x
topology: tpu7x:2x2x1
jax: 0.10.0
libtpu: 0.0.40
codegen_flags: <defaults>
</compile_context>

<pallas_src>
import functools

import jax
import jax.numpy as jnp
from jax import lax
from jax.experimental import pallas as pl
from jax.experimental.pallas import tpu as pltpu


def _round_up(x, m):
    return (x + m - 1) // m * m


def _ctrnn_md_kernel(ext_ref, gmul_ref, c_ref, w_h_ref, h0_ref,
                     out_ref, h_scr, *, oneminusalpha, t_block):
    """One grid step = `t_block` timesteps of the recurrence for one batch block.

    Pre-fused inputs (built in the wrapper, outside the serial chain):
      ext_ref[tt] = alpha * (x[t] @ W_in^T)                      (t_block, B, H)
      gmul_ref    = sub_id @ mul_gates                           (B, H)
      c_ref       = alpha * (b_in + gmul * b_h + sub_id@add_g)   (B, H)
      w_h_ref     = alpha * W_h^T                                (H, H)
    Per step:  h = relu(h*(1-alpha) + ext[tt] + gmul*(h @ W_hA) + c)
    """
    t_blk = pl.program_id(1)

    @pl.when(t_blk == 0)
    def _init():
        h_scr[...] = h0_ref[...]

    gmul = gmul_ref[...]
    c = c_ref[...]
    w_h = w_h_ref[...]

    def step(tt, h):
        rec = jnp.dot(h, w_h, preferred_element_type=jnp.float32)
        h_new = jnp.maximum(h * oneminusalpha + ext_ref[tt] + gmul * rec + c, 0.0)
        out_ref[tt] = h_new
        return h_new

    h_scr[...] = lax.fori_loop(0, t_block, step, h_scr[...], unroll=True)


def ctrnn_md_forward(x, sub_id, w_in_t, b_in, w_h_t, b_h, mul_gates, add_gates,
                     hidden0, *, alpha, t_block=8, b_block=None):
    """Runs the full CTRNN_MD recurrence inside one pallas_call.

    Args:
      x:         (seq_len, batch, input_size)  f32
      sub_id:    (batch, md_size)              f32
      w_in_t:    (input_size, hidden_size)     f32  (input2h.weight.T)
      b_in:      (1, hidden_size)              f32
      w_h_t:     (hidden_size, hidden_size)    f32  (h2h.weight.T)
      b_h:       (1, hidden_size)              f32
      mul_gates: (md_size, hidden_size)        f32
      add_gates: (md_size, hidden_size)        f32
      hidden0:   (batch, hidden_size)          f32
    Returns:
      output: (seq_len, batch, hidden_size), hidden_final: (batch, hidden_size)
    """
    seq_len, batch, input_size = x.shape
    hidden_size = w_in_t.shape[1]
    f32 = jnp.float32
    alpha = float(alpha)

    # --- Hoisted out of the serial recurrence (plain XLA, runs once) ---------
    gmul = jnp.dot(sub_id, mul_gates, precision='highest')            # (B, H)
    gadd = jnp.dot(sub_id, add_gates, precision='highest')            # (B, H)
    ext = jnp.dot(x.reshape(seq_len * batch, input_size), w_in_t,
                  precision='highest').reshape(seq_len, batch, hidden_size)
    ext_a = (alpha * ext).astype(f32)                                 # alpha folded in
    c_a = (alpha * (b_in + gmul * b_h + gadd)).astype(f32)            # (B, H)
    w_h_a = (alpha * w_h_t).astype(f32)                               # (H, H)

    # --- Pad to TPU-friendly shapes: batch->x8, hidden->x128, seq->x t_block -
    b_p = _round_up(batch, 8)
    h_p = _round_up(hidden_size, 128)
    if b_block is None:
        b_block = b_p
    b_p = _round_up(b_p, b_block)
    t_p = _round_up(seq_len, t_block)

    ext_p = jnp.zeros((t_p, b_p, h_p), f32).at[:seq_len, :batch, :hidden_size].set(ext_a)
    gmul_p = jnp.zeros((b_p, h_p), f32).at[:batch, :hidden_size].set(gmul.astype(f32))
    c_p = jnp.zeros((b_p, h_p), f32).at[:batch, :hidden_size].set(c_a)
    w_p = jnp.zeros((h_p, h_p), f32).at[:hidden_size, :hidden_size].set(w_h_a)
    h0_p = jnp.zeros((b_p, h_p), f32).at[:batch, :hidden_size].set(hidden0.astype(f32))

    kernel = functools.partial(_ctrnn_md_kernel,
                               oneminusalpha=1.0 - alpha,
                               t_block=t_block)

    grid = (b_p // b_block, t_p // t_block)
    grid_spec = pltpu.PrefetchScalarGridSpec(
        num_scalar_prefetch=0,
        grid=grid,
        in_specs=[
            pl.BlockSpec((t_block, b_block, h_p), lambda b, t: (t, b, 0)),  # ext (alpha-scaled)
            pl.BlockSpec((b_block, h_p), lambda b, t: (b, 0)),              # gmul
            pl.BlockSpec((b_block, h_p), lambda b, t: (b, 0)),              # fused bias c
            pl.BlockSpec((h_p, h_p), lambda b, t: (0, 0)),                  # alpha * W_h^T
            pl.BlockSpec((b_block, h_p), lambda b, t: (b, 0)),              # hidden0
        ],
        out_specs=pl.BlockSpec((t_block, b_block, h_p), lambda b, t: (t, b, 0)),
        scratch_shapes=[
            pltpu.VMEM((b_block, h_p), f32),   # hidden carry across time blocks
        ],
    )

    out_p = pl.pallas_call(
        kernel,
        out_shape=jax.ShapeDtypeStruct((t_p, b_p, h_p), f32),
        grid_spec=grid_spec,
        compiler_params=pltpu.CompilerParams(
            # batch blocks are independent (megacore-shardable); time is serial.
            dimension_semantics=("parallel", "arbitrary"),
            vmem_limit_bytes=64 * 1024 * 1024,
        ),
    )(ext_p, gmul_p, c_p, w_p, h0_p)

    out = out_p[:seq_len, :batch, :hidden_size]
    h_final = out[seq_len - 1]
    return out, h_final


def _reference_forward(x, sub_id, w_in_t, b_in, w_h_t, b_h, mul_gates, add_gates,
                       hidden0, *, alpha):
    """Pure-JAX reference mirroring the PyTorch forward loop (unfused math)."""
    oneminusalpha = 1.0 - alpha
    gmul = jnp.dot(sub_id, mul_gates, precision='highest')
    gadd = jnp.dot(sub_id, add_gates, precision='highest')

    def step(h, x_t):
        ext = jnp.dot(x_t, w_in_t, precision='highest') + b_in
        rec = jnp.dot(h, w_h_t, precision='highest') + b_h
        rec = gmul * rec
        rec = gadd + rec
        h_new = jnp.maximum(h * oneminusalpha + (ext + rec) * alpha, 0.0)
        return h_new, h_new

    h_final, outs = jax.lax.scan(step, hidden0, x)
    return outs, h_final


if __name__ == "__main__":
    # --- Problem sizes (small, consistent with the module's shape conventions) ---
    seq_len, batch = 8, 4
    input_size, hidden_size, md_size = 16, 32, 4
    dt, tau = 100.0, 200.0
    alpha = dt / tau
    g = 0.5

    key = jax.random.PRNGKey(0)
    keys = jax.random.split(key, 8)

    # --- Deterministic parameter initialization (mirroring __init__ shapes) ---
    bound_in = 1.0 / jnp.sqrt(jnp.float32(input_size))
    w_in = jax.random.uniform(keys[0], (hidden_size, input_size),
                              minval=-bound_in, maxval=bound_in, dtype=jnp.float32)
    b_in = jax.random.uniform(keys[1], (1, hidden_size),
                              minval=-bound_in, maxval=bound_in, dtype=jnp.float32)
    w_h = g * jnp.eye(hidden_size, dtype=jnp.float32)              # eye init * g
    bound_h = 1.0 / jnp.sqrt(jnp.float32(hidden_size))
    b_h = jax.random.uniform(keys[2], (1, hidden_size),
                             minval=-bound_h, maxval=bound_h, dtype=jnp.float32)
    # mul_gates: sparse normal(mean, std) -> relu (sparse_with_mean analogue)
    gates_mean, gates_std, gates_sparsity = 1.0, 0.5, 0.5
    raw = gates_mean + gates_std * jax.random.normal(keys[3], (md_size, hidden_size),
                                                     dtype=jnp.float32)
    keep = (jax.random.uniform(keys[4], (md_size, hidden_size)) > gates_sparsity)
    mul_gates = jnp.maximum(jnp.where(keep, raw, 0.0), 0.0)
    # add_gates: xavier_uniform with gain = sqrt(2) (relu gain)
    gain = jnp.sqrt(jnp.float32(2.0))
    limit = gain * jnp.sqrt(6.0 / jnp.float32(md_size + hidden_size))
    add_gates = jax.random.uniform(keys[5], (md_size, hidden_size),
                                   minval=-limit, maxval=limit, dtype=jnp.float32)

    # --- Inputs ---
    x = jax.random.normal(keys[6], (seq_len, batch, input_size), dtype=jnp.float32)
    ctx = jax.random.randint(keys[7], (batch,), 0, md_size)
    sub_id = jax.nn.one_hot(ctx, md_size, dtype=jnp.float32)
    hidden0 = jnp.zeros((batch, hidden_size), dtype=jnp.float32)   # init_hidden

    w_in_t = w_in.T   # (input_size, hidden_size)
    w_h_t = w_h.T     # (hidden_size, hidden_size)

    out, h_final = ctrnn_md_forward(x, sub_id, w_in_t, b_in, w_h_t, b_h,
                                    mul_gates, add_gates, hidden0,
                                    alpha=alpha, t_block=8)
    out = jax.block_until_ready(out)
    h_final = jax.block_until_ready(h_final)

    # Correctness check against a pure-JAX reference of the same recurrence.
    out_ref, h_ref = _reference_forward(x, sub_id, w_in_t, b_in, w_h_t, b_h,
                                        mul_gates, add_gates, hidden0, alpha=alpha)
    assert out.shape == (seq_len, batch, hidden_size)
    assert h_final.shape == (batch, hidden_size)
    assert jnp.allclose(out, out_ref, atol=1e-4, rtol=1e-4)
    assert jnp.allclose(h_final, h_ref, atol=1e-4, rtol=1e-4)

    # TODO(synk): divide_gating_to_input_and_recurrence=True branch (masked sub_id
    # split across MD halves with -|gates| on the input path) not implemented;
    # the default (False) branch is modeled.
    print("KERNEL_OK")
</pallas_src>

<mosaic_0001>
module attributes {stable_mosaic.version = 11 : i64} {
  func.func @_ctrnn_md_kernel(%arg0: i32, %arg1: i32, %arg2: memref<8x8x128xf32, #tpu.memory_space<vmem>>, %arg3: memref<8x128xf32, #tpu.memory_space<vmem>>, %arg4: memref<8x128xf32, #tpu.memory_space<vmem>>, %arg5: memref<128x128xf32, #tpu.memory_space<vmem>>, %arg6: memref<8x128xf32, #tpu.memory_space<vmem>>, %arg7: memref<8x8x128xf32, #tpu.memory_space<vmem>>, %arg8: memref<8x128xf32, #tpu.memory_space<vmem>>) attributes {dimension_semantics = [#tpu.dimension_semantics<parallel>, #tpu.dimension_semantics<arbitrary>], iteration_bounds = array<i64: 1, 1>, scalar_prefetch = 0 : i64, scratch_operands = 1 : i64, tpu.core_type = #tpu.core_type<tc>, window_params = [{transform_indices = @transform_0, window_bounds = array<i64: 8, 8, 128>}, {transform_indices = @transform_1, window_bounds = array<i64: 8, 128>}, {transform_indices = @transform_2, window_bounds = array<i64: 8, 128>}, {pipeline_mode = #tpu.pipeline_mode<synchronous>, transform_indices = @transform_3, window_bounds = array<i64: 128, 128>}, {transform_indices = @transform_4, window_bounds = array<i64: 8, 128>}, {transform_indices = @transform_5, window_bounds = array<i64: 8, 8, 128>}]} {
    %c0_i32 = arith.constant 0 : i32
    %0 = arith.cmpi eq, %arg1, %c0_i32 : i32
    %1 = arith.extui %0 : i1 to i32
    %c0_i32_0 = arith.constant 0 : i32
    %2 = arith.cmpi ne, %1, %c0_i32_0 : i32
    scf.if %2 {
      %c0_66 = arith.constant 0 : index
      %c0_67 = arith.constant 0 : index
      %136 = vector.load %arg6[%c0_66, %c0_67] : memref<8x128xf32, #tpu.memory_space<vmem>>, vector<8x128xf32>
      %c0_68 = arith.constant 0 : index
      %c0_69 = arith.constant 0 : index
      %137 = vector.load %arg8[%c0_68, %c0_69] : memref<8x128xf32, #tpu.memory_space<vmem>>, vector<8x128xf32>
      tpu.vector_store %arg8[%c0_68, %c0_69], %136 {strides = array<i32>} : memref<8x128xf32, #tpu.memory_space<vmem>>, vector<8x128xf32>,
    } else {
    }
    %c0 = arith.constant 0 : index
    %c0_1 = arith.constant 0 : index
    %3 = vector.load %arg3[%c0, %c0_1] : memref<8x128xf32, #tpu.memory_space<vmem>>, vector<8x128xf32>
    %c0_2 = arith.constant 0 : index
    %c0_3 = arith.constant 0 : index
    %4 = vector.load %arg4[%c0_2, %c0_3] : memref<8x128xf32, #tpu.memory_space<vmem>>, vector<8x128xf32>
    %c0_4 = arith.constant 0 : index
    %c0_5 = arith.constant 0 : index
    %5 = vector.load %arg5[%c0_4, %c0_5] : memref<128x128xf32, #tpu.memory_space<vmem>>, vector<128x128xf32>
    %c0_6 = arith.constant 0 : index
    %c0_7 = arith.constant 0 : index
    %6 = vector.load %arg8[%c0_6, %c0_7] : memref<8x128xf32, #tpu.memory_space<vmem>>, vector<8x128xf32>
    %c0_i32_8 = arith.constant 0 : i32
    %cst = arith.constant dense<0.000000e+00> : vector<8x128xf32>
    %7 = tpu.matmul %6, %5, %cst {dimension_numbers = #tpu.dot_dimension_numbers<[1], [0], [0], [1], [0, 0, 1, 1], [], []>} : vector<8x128xf32>, vector<128x128xf32>, vector<8x128xf32> -> vector<8x128xf32>
    %cst_9 = arith.constant 5.000000e-01 : f32
    %8 = vector.broadcast %cst_9 : f32 to vector<8x128xf32>
    %9 = arith.mulf %6, %8 : vector<8x128xf32>
    %10 = arith.index_cast %c0_i32_8 : i32 to index
    %c0_10 = arith.constant 0 : index
    %c0_11 = arith.constant 0 : index
    %11 = vector.load %arg2[%10, %c0_10, %c0_11] : memref<8x8x128xf32, #tpu.memory_space<vmem>>, vector<1x8x128xf32>
    %12 = vector.shape_cast %11 : vector<1x8x128xf32> to vector<8x128xf32>
    %13 = arith.addf %9, %12 : vector<8x128xf32>
    %14 = arith.mulf %3, %7 : vector<8x128xf32>
    %15 = arith.addf %13, %14 : vector<8x128xf32>
    %16 = arith.addf %15, %4 : vector<8x128xf32>
    %cst_12 = arith.constant 0.000000e+00 : f32
    %17 = vector.broadcast %cst_12 : f32 to vector<8x128xf32>
    %18 = arith.maximumf %16, %17 : vector<8x128xf32>
    %19 = arith.index_cast %c0_i32_8 : i32 to index
    %c0_13 = arith.constant 0 : index
    %c0_14 = arith.constant 0 : index
    %20 = vector.load %arg7[%19, %c0_13, %c0_14] : memref<8x8x128xf32, #tpu.memory_space<vmem>>, vector<1x8x128xf32>
    %21 = vector.shape_cast %20 : vector<1x8x128xf32> to vector<8x128xf32>
    %22 = vector.shape_cast %18 : vector<8x128xf32> to vector<1x8x128xf32>
    tpu.vector_store %arg7[%19, %c0_13, %c0_14], %22 {strides = array<i32>} : memref<8x8x128xf32, #tpu.memory_space<vmem>>, vector<1x8x128xf32>,
    %c1_i32 = arith.constant 1 : i32
    %cst_15 = arith.constant dense<0.000000e+00> : vector<8x128xf32>
    %23 = tpu.matmul %18, %5, %cst_15 {dimension_numbers = #tpu.dot_dimension_numbers<[1], [0], [0], [1], [0, 0, 1, 1], [], []>} : vector<8x128xf32>, vector<128x128xf32>, vector<8x128xf32> -> vector<8x128xf32>
    %cst_16 = arith.constant 5.000000e-01 : f32
    %24 = vector.broadcast %cst_16 : f32 to vector<8x128xf32>
    %25 = arith.mulf %18, %24 : vector<8x128xf32>
    %26 = arith.index_cast %c1_i32 : i32 to index
    %c0_17 = arith.constant 0 : index
    %c0_18 = arith.constant 0 : index
    %27 = vector.load %arg2[%26, %c0_17, %c0_18] : memref<8x8x128xf32, #tpu.memory_space<vmem>>, vector<1x8x128xf32>
    %28 = vector.shape_cast %27 : vector<1x8x128xf32> to vector<8x128xf32>
    %29 = arith.addf %25, %28 : vector<8x128xf32>
    %30 = arith.mulf %3, %23 : vector<8x128xf32>
    %31 = arith.addf %29, %30 : vector<8x128xf32>
    %32 = arith.addf %31, %4 : vector<8x128xf32>
    %cst_19 = arith.constant 0.000000e+00 : f32
    %33 = vector.broadcast %cst_19 : f32 to vector<8x128xf32>
    %34 = arith.maximumf %32, %33 : vector<8x128xf32>
    %35 = arith.index_cast %c1_i32 : i32 to index
    %c0_20 = arith.constant 0 : index
    %c0_21 = arith.constant 0 : index
    %36 = vector.load %arg7[%35, %c0_20, %c0_21] : memref<8x8x128xf32, #tpu.memory_space<vmem>>, vector<1x8x128xf32>
    %37 = vector.shape_cast %36 : vector<1x8x128xf32> to vector<8x128xf32>
    %38 = vector.shape_cast %34 : vector<8x128xf32> to vector<1x8x128xf32>
    tpu.vector_store %arg7[%35, %c0_20, %c0_21], %38 {strides = array<i32>} : memref<8x8x128xf32, #tpu.memory_space<vmem>>, vector<1x8x128xf32>,
    %c2_i32 = arith.constant 2 : i32
    %cst_22 = arith.constant dense<0.000000e+00> : vector<8x128xf32>
    %39 = tpu.matmul %34, %5, %cst_22 {dimension_numbers = #tpu.dot_dimension_numbers<[1], [0], [0], [1], [0, 0, 1, 1], [], []>} : vector<8x128xf32>, vector<128x128xf32>, vector<8x128xf32> -> vector<8x128xf32>
    %cst_23 = arith.constant 5.000000e-01 : f32
    %40 = vector.broadcast %cst_23 : f32 to vector<8x128xf32>
    %41 = arith.mulf %34, %40 : vector<8x128xf32>
    %42 = arith.index_cast %c2_i32 : i32 to index
    %c0_24 = arith.constant 0 : index
    %c0_25 = arith.constant 0 : index
    %43 = vector.load %arg2[%42, %c0_24, %c0_25] : memref<8x8x128xf32, #tpu.memory_space<vmem>>, vector<1x8x128xf32>
    %44 = vector.shape_cast %43 : vector<1x8x128xf32> to vector<8x128xf32>
    %45 = arith.addf %41, %44 : vector<8x128xf32>
    %46 = arith.mulf %3, %39 : vector<8x128xf32>
    %47 = arith.addf %45, %46 : vector<8x128xf32>
    %48 = arith.addf %47, %4 : vector<8x128xf32>
    %cst_26 = arith.constant 0.000000e+00 : f32
    %49 = vector.broadcast %cst_26 : f32 to vector<8x128xf32>
    %50 = arith.maximumf %48, %49 : vector<8x128xf32>
    %51 = arith.index_cast %c2_i32 : i32 to index
    %c0_27 = arith.constant 0 : index
    %c0_28 = arith.constant 0 : index
    %52 = vector.load %arg7[%51, %c0_27, %c0_28] : memref<8x8x128xf32, #tpu.memory_space<vmem>>, vector<1x8x128xf32>
    %53 = vector.shape_cast %52 : vector<1x8x128xf32> to vector<8x128xf32>
    %54 = vector.shape_cast %50 : vector<8x128xf32> to vector<1x8x128xf32>
    tpu.vector_store %arg7[%51, %c0_27, %c0_28], %54 {strides = array<i32>} : memref<8x8x128xf32, #tpu.memory_space<vmem>>, vector<1x8x128xf32>,
    %c3_i32 = arith.constant 3 : i32
    %cst_29 = arith.constant dense<0.000000e+00> : vector<8x128xf32>
    %55 = tpu.matmul %50, %5, %cst_29 {dimension_numbers = #tpu.dot_dimension_numbers<[1], [0], [0], [1], [0, 0, 1, 1], [], []>} : vector<8x128xf32>, vector<128x128xf32>, vector<8x128xf32> -> vector<8x128xf32>
    %cst_30 = arith.constant 5.000000e-01 : f32
    %56 = vector.broadcast %cst_30 : f32 to vector<8x128xf32>
    %57 = arith.mulf %50, %56 : vector<8x128xf32>
    %58 = arith.index_cast %c3_i32 : i32 to index
    %c0_31 = arith.constant 0 : index
    %c0_32 = arith.constant 0 : index
    %59 = vector.load %arg2[%58, %c0_31, %c0_32] : memref<8x8x128xf32, #tpu.memory_space<vmem>>, vector<1x8x128xf32>
    %60 = vector.shape_cast %59 : vector<1x8x128xf32> to vector<8x128xf32>
    %61 = arith.addf %57, %60 : vector<8x128xf32>
    %62 = arith.mulf %3, %55 : vector<8x128xf32>
    %63 = arith.addf %61, %62 : vector<8x128xf32>
    %64 = arith.addf %63, %4 : vector<8x128xf32>
    %cst_33 = arith.constant 0.000000e+00 : f32
    %65 = vector.broadcast %cst_33 : f32 to vector<8x128xf32>
    %66 = arith.maximumf %64, %65 : vector<8x128xf32>
    %67 = arith.index_cast %c3_i32 : i32 to index
    %c0_34 = arith.constant 0 : index
    %c0_35 = arith.constant 0 : index
    %68 = vector.load %arg7[%67, %c0_34, %c0_35] : memref<8x8x128xf32, #tpu.memory_space<vmem>>, vector<1x8x128xf32>
    %69 = vector.shape_cast %68 : vector<1x8x128xf32> to vector<8x128xf32>
    %70 = vector.shape_cast %66 : vector<8x128xf32> to vector<1x8x128xf32>
    tpu.vector_store %arg7[%67, %c0_34, %c0_35], %70 {strides = array<i32>} : memref<8x8x128xf32, #tpu.memory_space<vmem>>, vector<1x8x128xf32>,
    %c4_i32 = arith.constant 4 : i32
    %cst_36 = arith.constant dense<0.000000e+00> : vector<8x128xf32>
    %71 = tpu.matmul %66, %5, %cst_36 {dimension_numbers = #tpu.dot_dimension_numbers<[1], [0], [0], [1], [0, 0, 1, 1], [], []>} : vector<8x128xf32>, vector<128x128xf32>, vector<8x128xf32> -> vector<8x128xf32>
    %cst_37 = arith.constant 5.000000e-01 : f32
    %72 = vector.broadcast %cst_37 : f32 to vector<8x128xf32>
    %73 = arith.mulf %66, %72 : vector<8x128xf32>
    %74 = arith.index_cast %c4_i32 : i32 to index
    %c0_38 = arith.constant 0 : index
    %c0_39 = arith.constant 0 : index
    %75 = vector.load %arg2[%74, %c0_38, %c0_39] : memref<8x8x128xf32, #tpu.memory_space<vmem>>, vector<1x8x128xf32>
    %76 = vector.shape_cast %75 : vector<1x8x128xf32> to vector<8x128xf32>
    %77 = arith.addf %73, %76 : vector<8x128xf32>
    %78 = arith.mulf %3, %71 : vector<8x128xf32>
    %79 = arith.addf %77, %78 : vector<8x128xf32>
    %80 = arith.addf %79, %4 : vector<8x128xf32>
    %cst_40 = arith.constant 0.000000e+00 : f32
    %81 = vector.broadcast %cst_40 : f32 to vector<8x128xf32>
    %82 = arith.maximumf %80, %81 : vector<8x128xf32>
    %83 = arith.index_cast %c4_i32 : i32 to index
    %c0_41 = arith.constant 0 : index
    %c0_42 = arith.constant 0 : index
    %84 = vector.load %arg7[%83, %c0_41, %c0_42] : memref<8x8x128xf32, #tpu.memory_space<vmem>>, vector<1x8x128xf32>
    %85 = vector.shape_cast %84 : vector<1x8x128xf32> to vector<8x128xf32>
    %86 = vector.shape_cast %82 : vector<8x128xf32> to vector<1x8x128xf32>
    tpu.vector_store %arg7[%83, %c0_41, %c0_42], %86 {strides = array<i32>} : memref<8x8x128xf32, #tpu.memory_space<vmem>>, vector<1x8x128xf32>,
    %c5_i32 = arith.constant 5 : i32
    %cst_43 = arith.constant dense<0.000000e+00> : vector<8x128xf32>
    %87 = tpu.matmul %82, %5, %cst_43 {dimension_numbers = #tpu.dot_dimension_numbers<[1], [0], [0], [1], [0, 0, 1, 1], [], []>} : vector<8x128xf32>, vector<128x128xf32>, vector<8x128xf32> -> vector<8x128xf32>
    %cst_44 = arith.constant 5.000000e-01 : f32
    %88 = vector.broadcast %cst_44 : f32 to vector<8x128xf32>
    %89 = arith.mulf %82, %88 : vector<8x128xf32>
    %90 = arith.index_cast %c5_i32 : i32 to index
    %c0_45 = arith.constant 0 : index
    %c0_46 = arith.constant 0 : index
    %91 = vector.load %arg2[%90, %c0_45, %c0_46] : memref<8x8x128xf32, #tpu.memory_space<vmem>>, vector<1x8x128xf32>
    %92 = vector.shape_cast %91 : vector<1x8x128xf32> to vector<8x128xf32>
    %93 = arith.addf %89, %92 : vector<8x128xf32>
    %94 = arith.mulf %3, %87 : vector<8x128xf32>
    %95 = arith.addf %93, %94 : vector<8x128xf32>
    %96 = arith.addf %95, %4 : vector<8x128xf32>
    %cst_47 = arith.constant 0.000000e+00 : f32
    %97 = vector.broadcast %cst_47 : f32 to vector<8x128xf32>
    %98 = arith.maximumf %96, %97 : vector<8x128xf32>
    %99 = arith.index_cast %c5_i32 : i32 to index
    %c0_48 = arith.constant 0 : index
    %c0_49 = arith.constant 0 : index
    %100 = vector.load %arg7[%99, %c0_48, %c0_49] : memref<8x8x128xf32, #tpu.memory_space<vmem>>, vector<1x8x128xf32>
    %101 = vector.shape_cast %100 : vector<1x8x128xf32> to vector<8x128xf32>
    %102 = vector.shape_cast %98 : vector<8x128xf32> to vector<1x8x128xf32>
    tpu.vector_store %arg7[%99, %c0_48, %c0_49], %102 {strides = array<i32>} : memref<8x8x128xf32, #tpu.memory_space<vmem>>, vector<1x8x128xf32>,
    %c6_i32 = arith.constant 6 : i32
    %cst_50 = arith.constant dense<0.000000e+00> : vector<8x128xf32>
    %103 = tpu.matmul %98, %5, %cst_50 {dimension_numbers = #tpu.dot_dimension_numbers<[1], [0], [0], [1], [0, 0, 1, 1], [], []>} : vector<8x128xf32>, vector<128x128xf32>, vector<8x128xf32> -> vector<8x128xf32>
    %cst_51 = arith.constant 5.000000e-01 : f32
    %104 = vector.broadcast %cst_51 : f32 to vector<8x128xf32>
    %105 = arith.mulf %98, %104 : vector<8x128xf32>
    %106 = arith.index_cast %c6_i32 : i32 to index
    %c0_52 = arith.constant 0 : index
    %c0_53 = arith.constant 0 : index
    %107 = vector.load %arg2[%106, %c0_52, %c0_53] : memref<8x8x128xf32, #tpu.memory_space<vmem>>, vector<1x8x128xf32>
    %108 = vector.shape_cast %107 : vector<1x8x128xf32> to vector<8x128xf32>
    %109 = arith.addf %105, %108 : vector<8x128xf32>
    %110 = arith.mulf %3, %103 : vector<8x128xf32>
    %111 = arith.addf %109, %110 : vector<8x128xf32>
    %112 = arith.addf %111, %4 : vector<8x128xf32>
    %cst_54 = arith.constant 0.000000e+00 : f32
    %113 = vector.broadcast %cst_54 : f32 to vector<8x128xf32>
    %114 = arith.maximumf %112, %113 : vector<8x128xf32>
    %115 = arith.index_cast %c6_i32 : i32 to index
    %c0_55 = arith.constant 0 : index
    %c0_56 = arith.constant 0 : index
    %116 = vector.load %arg7[%115, %c0_55, %c0_56] : memref<8x8x128xf32, #tpu.memory_space<vmem>>, vector<1x8x128xf32>
    %117 = vector.shape_cast %116 : vector<1x8x128xf32> to vector<8x128xf32>
    %118 = vector.shape_cast %114 : vector<8x128xf32> to vector<1x8x128xf32>
    tpu.vector_store %arg7[%115, %c0_55, %c0_56], %118 {strides = array<i32>} : memref<8x8x128xf32, #tpu.memory_space<vmem>>, vector<1x8x128xf32>,
    %c7_i32 = arith.constant 7 : i32
    %cst_57 = arith.constant dense<0.000000e+00> : vector<8x128xf32>
    %119 = tpu.matmul %114, %5, %cst_57 {dimension_numbers = #tpu.dot_dimension_numbers<[1], [0], [0], [1], [0, 0, 1, 1], [], []>} : vector<8x128xf32>, vector<128x128xf32>, vector<8x128xf32> -> vector<8x128xf32>
    %cst_58 = arith.constant 5.000000e-01 : f32
    %120 = vector.broadcast %cst_58 : f32 to vector<8x128xf32>
    %121 = arith.mulf %114, %120 : vector<8x128xf32>
    %122 = arith.index_cast %c7_i32 : i32 to index
    %c0_59 = arith.constant 0 : index
    %c0_60 = arith.constant 0 : index
    %123 = vector.load %arg2[%122, %c0_59, %c0_60] : memref<8x8x128xf32, #tpu.memory_space<vmem>>, vector<1x8x128xf32>
    %124 = vector.shape_cast %123 : vector<1x8x128xf32> to vector<8x128xf32>
    %125 = arith.addf %121, %124 : vector<8x128xf32>
    %126 = arith.mulf %3, %119 : vector<8x128xf32>
    %127 = arith.addf %125, %126 : vector<8x128xf32>
    %128 = arith.addf %127, %4 : vector<8x128xf32>
    %cst_61 = arith.constant 0.000000e+00 : f32
    %129 = vector.broadcast %cst_61 : f32 to vector<8x128xf32>
    %130 = arith.maximumf %128, %129 : vector<8x128xf32>
    %131 = arith.index_cast %c7_i32 : i32 to index
    %c0_62 = arith.constant 0 : index
    %c0_63 = arith.constant 0 : index
    %132 = vector.load %arg7[%131, %c0_62, %c0_63] : memref<8x8x128xf32, #tpu.memory_space<vmem>>, vector<1x8x128xf32>
    %133 = vector.shape_cast %132 : vector<1x8x128xf32> to vector<8x128xf32>
    %134 = vector.shape_cast %130 : vector<8x128xf32> to vector<1x8x128xf32>
    tpu.vector_store %arg7[%131, %c0_62, %c0_63], %134 {strides = array<i32>} : memref<8x8x128xf32, #tpu.memory_space<vmem>>, vector<1x8x128xf32>,
    %c8_i32 = arith.constant 8 : i32
    %c0_64 = arith.constant 0 : index
    %c0_65 = arith.constant 0 : index
    %135 = vector.load %arg8[%c0_64, %c0_65] : memref<8x128xf32, #tpu.memory_space<vmem>>, vector<8x128xf32>
    tpu.vector_store %arg8[%c0_64, %c0_65], %130 {strides = array<i32>} : memref<8x128xf32, #tpu.memory_space<vmem>>, vector<8x128xf32>,
    return
  }
  func.func @transform_0(%arg0: i32, %arg1: i32) -> (i32, i32, i32) {
    %c0_i32 = arith.constant 0 : i32
    %c0_i32_0 = arith.constant 0 : i32
    return %arg1, %arg0, %c0_i32 : i32, i32, i32
  }
  func.func @transform_1(%arg0: i32, %arg1: i32) -> (i32, i32) {
    %c0_i32 = arith.constant 0 : i32
    %c0_i32_0 = arith.constant 0 : i32
    return %arg0, %c0_i32 : i32, i32
  }
  func.func @transform_2(%arg0: i32, %arg1: i32) -> (i32, i32) {
    %c0_i32 = arith.constant 0 : i32
    %c0_i32_0 = arith.constant 0 : i32
    return %arg0, %c0_i32 : i32, i32
  }
  func.func @transform_3(%arg0: i32, %arg1: i32) -> (i32, i32) {
    %c0_i32 = arith.constant 0 : i32
    %c0_i32_0 = arith.constant 0 : i32
    %c0_i32_1 = arith.constant 0 : i32
    return %c0_i32, %c0_i32_0 : i32, i32
  }
  func.func @transform_4(%arg0: i32, %arg1: i32) -> (i32, i32) {
    %c0_i32 = arith.constant 0 : i32
    %c0_i32_0 = arith.constant 0 : i32
    return %arg0, %c0_i32 : i32, i32
  }
  func.func @transform_5(%arg0: i32, %arg1: i32) -> (i32, i32, i32) {
    %c0_i32 = arith.constant 0 : i32
    %c0_i32_0 = arith.constant 0 : i32
    return %arg1, %arg0, %c0_i32 : i32, i32, i32
  }
}

</mosaic_0001>

<bundles_post_ra>
// kernel: tpu_custom_call.1
= control target key start
LH: loop header
LB: loop body
LE: loop exit
PB: predicated region body
PF: predicated region fallthrough
CT: control target
= control target key end

     0   :  { %10 = vsyncpa [#allocation4], 0  ;;  %s1827_s0 = inlined_call_operand.hbm [shape: f32[8,8,128], index: 0, kind: input, shape index: {}]   ;;  %s1828_s1 = inlined_call_operand.hbm [shape: f32[8,128], index: 1, kind: input, shape index: {}]   ;;  %s1829_s2 = inlined_call_operand.hbm [shape: f32[8,128], index: 2, kind: input, shape index: {}]   ;;  %s1830_s3 = inlined_call_operand.hbm [shape: f32[128,128], index: 3, kind: input, shape index: {}]   ;;  %s1831_s4 = inlined_call_operand.hbm [shape: f32[8,128], index: 4, kind: input, shape index: {}]   ;;  %s1832_s5 = inlined_call_operand.hbm [shape: f32[8,8,128], index: 5, kind: output, shape index: {}]  }
   0x1   :  { %11 = vsyncpa [#allocation7], 0 }
   0x2   :  { %12 = vsyncpa [#allocation10], 0 }
   0x3   :  { %13 = vsyncpa [#allocation5], 0  ;;  %s1525_s18 = smov [#allocation6]   ;;  %s1385_s22 = scalar_lea.hbm %s1828_s1, 128 }
   0x4   :  { %s32_s19 = sshll.u32 %s1525_s18, 4  ;;  %p1386_p0 = scmp.ne.s32.totalorder %s1828_s1, %s1385_s22  ;;  %s33_s19 = int_to_ptr.vmem [resolvable:$true] %s32_s19 }
   0x5   :  { %p1389_p1 = scmp.lt.u32.totalorder %s1385_s22, %s1828_s1 }
   0x7   :  { %p1391_p2 = pnand %p1389_p1, %p1386_p0 }
   0x9   :  { %1394 = shalt.err (!%p1391_p2)
}
   0xa   :  { %s1395_s27 = scalar_lea.vmem %s33_s19, 128  ;;  %p1400_p4 = scmp.lt.s32.totalorder %s33_s19, %s33_s19 }
   0xb   :  { %p1396_p3 = scmp.ne.s32.totalorder %s33_s19, %s1395_s27  ;;  %p1401_p5 = scmp.lt.s32.totalorder %s1395_s27, %s1395_s27 }
   0xd   :  { %p1402_p6 = por %p1401_p5, %p1400_p4 }
   0xf   :  { %p1403_p7 = pnand %p1402_p6, %p1396_p3 }
  0x11   :  { %1406 = shalt.err (!%p1403_p7)
}
  0x12   :  { %35 = dma.hbm_to_vmem [thread:$0]  %s1828_s1, 128, %s33_s19, [#allocation7]  }
  0x13   :  { %s1526_s30 = smov [#allocation9]   ;;  %s1527_s7 = smov [#allocation3]  }
  0x14   :  { %s51_s6 = sshll.u32 %s1526_s30, 4  ;;  %s19_s8 = sshll.u32 %s1527_s7, 4  ;;  %s52_s6 = int_to_ptr.vmem [resolvable:$true] %s51_s6  ;;  %s20_s8 = int_to_ptr.vmem [resolvable:$true] %s19_s8 }
  0x15   :  { %s1407_s11 = scalar_lea.hbm %s1830_s3, 2048 }
  0x16   :  { %p1408_p8 = scmp.ne.s32.totalorder %s1830_s3, %s1407_s11  ;;  %p1411_p9 = scmp.lt.u32.totalorder %s1407_s11, %s1830_s3 }
  0x18   :  { %p1413_p10 = pnand %p1411_p9, %p1408_p8 }
  0x1a   :  { %1416 = shalt.err (!%p1413_p10)
}
  0x1b   :  { %s1417_s1 = scalar_lea.vmem %s52_s6, 2048  ;;  %p1422_p12 = scmp.lt.s32.totalorder %s52_s6, %s52_s6 }
  0x1c   :  { %p1418_p11 = scmp.ne.s32.totalorder %s52_s6, %s1417_s1  ;;  %p1423_p13 = scmp.lt.s32.totalorder %s1417_s1, %s1417_s1 }
  0x1e   :  { %p1424_p0 = por %p1423_p13, %p1422_p12 }
  0x20   :  { %p1425_p1 = pnand %p1424_p0, %p1418_p11 }
  0x22   :  { %1428 = shalt.err (!%p1425_p1)
}
  0x23   :  { %s1528_s16 = smov 128   ;;  %s1529_s17 = smov 8  }
  0x24   :  { %57 = dma.hbm_to_vmem [thread:$0]  %s1830_s3, 2048, %s52_s6, [#allocation10], %s1528_s16, %s1528_s16, %s1529_s17  }
  0x25   :  { %s1429_s22 = scalar_lea.hbm %s1827_s0, 1024 }
  0x26   :  { %p1430_p2 = scmp.ne.s32.totalorder %s1827_s0, %s1429_s22  ;;  %p1433_p3 = scmp.lt.u32.totalorder %s1429_s22, %s1827_s0 }
  0x28   :  { %p1435_p4 = pnand %p1433_p3, %p1430_p2 }
  0x2a   :  { %1438 = shalt.err (!%p1435_p4)
}
  0x2b   :  { %s1439_s27 = scalar_lea.vmem %s20_s8, 1024  ;;  %p1444_p6 = scmp.lt.s32.totalorder %s20_s8, %s20_s8 }
  0x2c   :  { %p1440_p5 = scmp.ne.s32.totalorder %s20_s8, %s1439_s27  ;;  %p1445_p7 = scmp.lt.s32.totalorder %s1439_s27, %s1439_s27 }
  0x2e   :  { %p1446_p8 = por %p1445_p7, %p1444_p6 }
  0x30   :  { %p1447_p9 = pnand %p1446_p8, %p1440_p5 }
  0x32   :  { %1450 = shalt.err (!%p1447_p9)
}
  0x33   :  { %25 = dma.hbm_to_vmem [thread:$0]  %s1827_s0, 1024, %s20_s8, [#allocation4], %s1528_s16, %s1528_s16, %s1529_s17  }
  0x34   :  { %s1530_s29 = smov [#allocation8]   ;;  %s1531_s6 = smov [#allocation11]  }
  0x35   :  { %s42_s30 = sshll.u32 %s1530_s29, 4  ;;  %s64_s7 = sshll.u32 %s1531_s6, 4  ;;  %s43_s30 = int_to_ptr.vmem [resolvable:$true] %s42_s30  ;;  %s65_s7 = int_to_ptr.vmem [resolvable:$true] %s64_s7 }
  0x36   :  { %s1451_s11 = scalar_lea.hbm %s1829_s2, 128 }
  0x37   :  { %p1452_p10 = scmp.ne.s32.totalorder %s1829_s2, %s1451_s11  ;;  %p1455_p11 = scmp.lt.u32.totalorder %s1451_s11, %s1829_s2 }
  0x39   :  { %p1457_p12 = pnand %p1455_p11, %p1452_p10 }
  0x3b   :  { %1460 = shalt.err (!%p1457_p12)
}
  0x3c   :  { %s1461_s0 = scalar_lea.vmem %s43_s30, 128  ;;  %p1466_p0 = scmp.lt.s32.totalorder %s43_s30, %s43_s30 }
  0x3d   :  { %p1462_p13 = scmp.ne.s32.totalorder %s43_s30, %s1461_s0  ;;  %p1467_p1 = scmp.lt.s32.totalorder %s1461_s0, %s1461_s0 }
  0x3f   :  { %p1468_p2 = por %p1467_p1, %p1466_p0 }
  0x41   :  { %p1469_p3 = pnand %p1468_p2, %p1462_p13 }
  0x43   :  { %1472 = shalt.err (!%p1469_p3)
}
  0x44   :  { %45 = dma.hbm_to_vmem [thread:$0]  %s1829_s2, 128, %s43_s30, [#allocation7]  }
  0x45   :  { %s1473_s20 = scalar_lea.hbm %s1831_s4, 128 }
  0x46   :  { %p1474_p4 = scmp.ne.s32.totalorder %s1831_s4, %s1473_s20  ;;  %p1477_p5 = scmp.lt.u32.totalorder %s1473_s20, %s1831_s4 }
  0x48   :  { %p1479_p6 = pnand %p1477_p5, %p1474_p4 }
  0x4a   :  { %1482 = shalt.err (!%p1479_p6)
}
  0x4b   :  { %s1483_s25 = scalar_lea.vmem %s65_s7, 128  ;;  %p1488_p8 = scmp.lt.s32.totalorder %s65_s7, %s65_s7 }
  0x4c   :  { %p1484_p7 = scmp.ne.s32.totalorder %s65_s7, %s1483_s25  ;;  %p1489_p9 = scmp.lt.s32.totalorder %s1483_s25, %s1483_s25 }
  0x4e   :  { %p1490_p10 = por %p1489_p9, %p1488_p8 }
  0x50   :  { %p1491_p11 = pnand %p1490_p10, %p1484_p7 }
  0x52   :  { %1494 = shalt.err (!%p1491_p11)
}
  0x53   :  { %67 = dma.hbm_to_vmem [thread:$0]  %s1831_s4, 128, %s65_s7, [#allocation10]  }
  0x54   :  { %1517 = dma.done.wait [#allocation4], 1024  }
  0x55   :  { %1518 = vsyncadd [#allocation4], 4294966272 }
  0x56   :  { %1519 = dma.done.wait [#allocation7], 256  }
  0x57   :  { %1520 = vsyncadd [#allocation7], 4294967040 }
  0x58   :  { %1521 = dma.done.wait [#allocation10], 2176  }
  0x59   :  { %1522 = vsyncadd [#allocation10], 4294965120  ;;  %v1532_v0 = vmov 0.0|0.0   ;;  %vm1533_vm0 = vmmov 0   ;;  %v1534_v1 = vmov 0.0   ;;  %v91_v2 = vld [vmem:[#allocation9] sm:$0xff] }
  0x5a   :  { %1182 = vmatprep.subr.bf16.mxu0 %v1532_v0  ;;  %934 = vmatprep.mubr.msk.f32.mxu0 %vm1533_vm0, %v1534_v1  ;;  %v92_v3 = vld [vmem:[#allocation9 + $0x8] sm:$0xff]  ;;  %v93_v4 = vld [vmem:[#allocation9 + $0x10] sm:$0xff]  ;;  %v94_v6 = vld [vmem:[#allocation9 + $0x18] sm:$0xff]  ;;  %s1535_s4 = smov [#allocation12]  }
  0x5b   :  { %1206 = vmatprep.subr.bf16.mxu1 %v1532_v0  ;;  %969 = vmatprep.mubr.msk.f32.mxu1 %vm1533_vm0, %v1534_v1  ;;  %v1638_v5 = vpack.c.bf16 %v92_v3, %v91_v2  ;;  %v1641_v7 = vpack.c.bf16 %v94_v6, %v93_v4  ;;  %v95_v8 = vld [vmem:[#allocation9 + $0x20] sm:$0xff]  ;;  %v96_v9 = vld [vmem:[#allocation9 + $0x28] sm:$0xff]  ;;  %v97_v11 = vld [vmem:[#allocation9 + $0x30] sm:$0xff]  ;;  %s752_s27 = sshll.u32 %s1535_s4, 4  ;;  %s753_s27 = int_to_ptr.vmem [resolvable:$true] %s752_s27 }
  0x5c   :  { %v1647_v10 = vpack.c.bf16 %v96_v9, %v95_v8  ;;  %v98_v12 = vld [vmem:[#allocation9 + $0x38] sm:$0xff]  ;;  %v99_v14 = vld [vmem:[#allocation9 + $0x40] sm:$0xff]  ;;  %v100_v15 = vld [vmem:[#allocation9 + $0x48] sm:$0xff]  ;;  %s1495_s3 = scalar_lea.vmem %s753_s27, 1024  ;;  %p1500_p13 = scmp.lt.s32.totalorder %s753_s27, %s753_s27 }
  0x5d   :  { %1184 = vmatpush3.bf16.msra.mxu0 %v1638_v5  ;;  %1208 = vmatpush3.bf16.msra.mxu1 %v1638_v5  ;;  %v1653_v13 = vpack.c.bf16 %v98_v12, %v97_v11  ;;  %v1659_v16 = vpack.c.bf16 %v100_v15, %v99_v14  ;;  %v101_v17 = vld [vmem:[#allocation9 + $0x50] sm:$0xff]  ;;  %v102_v18 = vld [vmem:[#allocation9 + $0x58] sm:$0xff]  ;;  %v103_v20 = vld [vmem:[#allocation9 + $0x60] sm:$0xff]  ;;  %p1496_p12 = scmp.ne.s32.totalorder %s753_s27, %s1495_s3  ;;  %p1501_p0 = scmp.lt.s32.totalorder %s1495_s3, %s1495_s3 }
  0x5e   :  { %1185 = vmatprep.subr.bf16.mxu0 %v1532_v0  ;;  %1209 = vmatprep.subr.bf16.mxu1 %v1532_v0  ;;  %v1665_v19 = vpack.c.bf16 %v102_v18, %v101_v17  ;;  %v104_v21 = vld [vmem:[#allocation9 + $0x68] sm:$0xff]  ;;  %v105_v23 = vld [vmem:[#allocation9 + $0x70] sm:$0xff]  ;;  %v106_v24 = vld [vmem:[#allocation9 + $0x78] sm:$0xff] }
  0x5f   :  { %v1671_v22 = vpack.c.bf16 %v104_v21, %v103_v20  ;;  %v1677_v25 = vpack.c.bf16 %v106_v24, %v105_v23  ;;  %v87_v26 = vld [vmem:[#allocation11] sm:$0xff]  ;;  %v179_v28 = vld [vmem:[#allocation3] sm:$0xff]  ;;  %v1707_v34 = vld [vmem:[#allocation8] sm:$0xff]  ;;  %p1502_p1 = por %p1501_p0, %p1500_p13 }
  0x60   :  { %v178_v27 = vmul.f32 0.5, %v87_v26  ;;  %v1704_v29 = vld [vmem:[#allocation6] sm:$0xff]  ;;  %v258_v39 = vld [vmem:[#allocation3 + $0x8] sm:$0xff]  ;;  %v338_v48 = vld [vmem:[#allocation3 + $0x10] sm:$0xff] }
  0x61   :  { %1187 = vmatpush3.bf16.msra.mxu0 %v1641_v7  ;;  %1211 = vmatpush3.bf16.msra.mxu1 %v1641_v7  ;;  %v418_v57 = vld [vmem:[#allocation3 + $0x18] sm:$0xff]  ;;  %v498_v4 = vld [vmem:[#allocation3 + $0x20] sm:$0xff]  ;;  %v658_v21 = vld [vmem:[#allocation3 + $0x30] sm:$0xff]  ;;  %p1503_p2 = pnand %p1502_p1, %p1496_p12 }
  0x62   :  { %1188 = vmatprep.subr.bf16.mxu0 %v1532_v0  ;;  %1212 = vmatprep.subr.bf16.mxu1 %v1532_v0  ;;  %v180_v30 = vadd.f32 %v179_v28, %v178_v27 }
  0x65   :  { %1190 = vmatpush3.bf16.msra.mxu0 %v1647_v10  ;;  %1214 = vmatpush3.bf16.msra.mxu1 %v1647_v10 }
  0x66   :  { %1191 = vmatprep.subr.bf16.mxu0 %v1532_v0  ;;  %1215 = vmatprep.subr.bf16.mxu1 %v1532_v0 }
  0x69   :  { %1193 = vmatpush3.bf16.msra.mxu0 %v1653_v13  ;;  %1217 = vmatpush3.bf16.msra.mxu1 %v1653_v13 }
  0x6a   :  { %1194 = vmatprep.subr.bf16.mxu0 %v1532_v0  ;;  %1218 = vmatprep.subr.bf16.mxu1 %v1532_v0 }
  0x6d   :  { %1196 = vmatpush3.bf16.msra.mxu0 %v1659_v16  ;;  %1220 = vmatpush3.bf16.msra.mxu1 %v1659_v16 }
  0x6e   :  { %1197 = vmatprep.subr.bf16.mxu0 %v1532_v0  ;;  %1221 = vmatprep.subr.bf16.mxu1 %v1532_v0 }
  0x71   :  { %1199 = vmatpush3.bf16.msra.mxu0 %v1665_v19  ;;  %1223 = vmatpush3.bf16.msra.mxu1 %v1665_v19 }
  0x72   :  { %1200 = vmatprep.subr.bf16.mxu0 %v1532_v0  ;;  %1224 = vmatprep.subr.bf16.mxu1 %v1532_v0 }
  0x75   :  { %1202 = vmatpush3.bf16.msra.mxu0 %v1671_v22  ;;  %1226 = vmatpush3.bf16.msra.mxu1 %v1671_v22 }
  0x76   :  { %1203 = vmatprep.subr.bf16.mxu0 %v1532_v0  ;;  %1227 = vmatprep.subr.bf16.mxu1 %v1532_v0 }
  0x79   :  { %1205 = vmatpush3.bf16.msra.mxu0 %v1677_v25  ;;  %1229 = vmatpush3.bf16.msra.mxu1 %v1677_v25 }
  0x7a   :  { %1230 = vmatprep.subr.bf16.mxu0 %v1532_v0  ;;  %1254 = vmatprep.subr.bf16.mxu1 %v1532_v0 }
  0x7c   :  { %935 = vmatmul.mubr.f32.vlgmr.msra.gmra.mrb[0].mxu0 %v87_v26 }
  0x7d   :  { %1232 = vmatpush3.bf16.msra.mxu0 %v1638_v5  ;;  %1004 = vmatprep.mubr.msk.f32.mxu0 %vm1533_vm0, %v1534_v1 }
  0x7e   :  { %1233 = vmatprep.subr.bf16.mxu0 %v1532_v0 }
  0x81   :  { %1235 = vmatpush3.bf16.msra.mxu0 %v1641_v7 }
  0x82   :  { %1236 = vmatprep.subr.bf16.mxu0 %v1532_v0 }
  0x85   :  { %1238 = vmatpush3.bf16.msra.mxu0 %v1647_v10 }
  0x86   :  { %1239 = vmatprep.subr.bf16.mxu0 %v1532_v0 }
  0x89   :  { %1241 = vmatpush3.bf16.msra.mxu0 %v1653_v13 }
  0x8a   :  { %1242 = vmatprep.subr.bf16.mxu0 %v1532_v0 }
  0x8d   :  { %1244 = vmatpush3.bf16.msra.mxu0 %v1659_v16 }
  0x8e   :  { %1245 = vmatprep.subr.bf16.mxu0 %v1532_v0 }
  0x91   :  { %1247 = vmatpush3.bf16.msra.mxu0 %v1665_v19 }
  0x92   :  { %1248 = vmatprep.subr.bf16.mxu0 %v1532_v0 }
  0x95   :  { %1250 = vmatpush3.bf16.msra.mxu0 %v1671_v22 }
  0x96   :  { %1251 = vmatprep.subr.bf16.mxu0 %v1532_v0 }
  0x99   :  { %1253 = vmatpush3.bf16.msra.mxu0 %v1677_v25 }
  0x9a   :  { %1278 = vmatprep.subr.bf16.mxu0 %v1532_v0 }
 0x14f   :  { %v174_v31 = vpop.f32.mrb[0].mxu0 }
 0x150   :  { %v181_v32 = vmul.f32 %v174_v31, %v1704_v29  ;;  %v936_v33 = vpop.f32.mrb[1].mxu0 }
 0x152   :  { %v182_v35 = vadd.f32 %v181_v32, %v180_v30  ;;  %v738_v30 = vld [vmem:[#allocation3 + $0x38] sm:$0xff] }
 0x154   :  { %v183_v36 = vadd.f32 %v182_v35, %v1707_v34 }
 0x156   :  { %v184_v37 = vmax.f32 %v183_v36, 0.0 }
 0x158   :  { %185 = vst [vmem:[#allocation12] sm:$0xff] %v184_v37  ;;  %970 = vmatmul.mubr.f32.vlgmr.msra.gmra.mrb[0].mxu1 %v184_v37  ;;  %v256_v38 = vmul.f32 0.5, %v184_v37 }
 0x159   :  { %1256 = vmatpush3.bf16.msra.mxu1 %v1638_v5  ;;  %1039 = vmatprep.mubr.msk.f32.mxu1 %vm1533_vm0, %v1534_v1 }
 0x15a   :  { %1257 = vmatprep.subr.bf16.mxu1 %v1532_v0  ;;  %v259_v41 = vadd.f32 %v258_v39, %v256_v38 }
 0x15d   :  { %1259 = vmatpush3.bf16.msra.mxu1 %v1641_v7 }
 0x15e   :  { %1260 = vmatprep.subr.bf16.mxu1 %v1532_v0 }
 0x161   :  { %1262 = vmatpush3.bf16.msra.mxu1 %v1647_v10 }
 0x162   :  { %1263 = vmatprep.subr.bf16.mxu1 %v1532_v0 }
 0x165   :  { %1265 = vmatpush3.bf16.msra.mxu1 %v1653_v13 }
 0x166   :  { %1266 = vmatprep.subr.bf16.mxu1 %v1532_v0 }
 0x169   :  { %1268 = vmatpush3.bf16.msra.mxu1 %v1659_v16 }
 0x16a   :  { %1269 = vmatprep.subr.bf16.mxu1 %v1532_v0 }
 0x16d   :  { %1271 = vmatpush3.bf16.msra.mxu1 %v1665_v19 }
 0x16e   :  { %1272 = vmatprep.subr.bf16.mxu1 %v1532_v0 }
 0x171   :  { %1274 = vmatpush3.bf16.msra.mxu1 %v1671_v22 }
 0x172   :  { %1275 = vmatprep.subr.bf16.mxu1 %v1532_v0 }
 0x175   :  { %1277 = vmatpush3.bf16.msra.mxu1 %v1677_v25 }
 0x176   :  { %1302 = vmatprep.subr.bf16.mxu1 %v1532_v0 }
 0x22b   :  { %v252_v40 = vpop.f32.mrb[0].mxu1 }
 0x22c   :  { %v260_v42 = vmul.f32 %v252_v40, %v1704_v29  ;;  %v971_v43 = vpop.f32.mrb[1].mxu1 }
 0x22e   :  { %v261_v44 = vadd.f32 %v260_v42, %v259_v41 }
 0x230   :  { %v262_v45 = vadd.f32 %v261_v44, %v1707_v34 }
 0x232   :  { %v263_v46 = vmax.f32 %v262_v45, 0.0 }
 0x234   :  { %265 = vst [vmem:[#allocation12 + $0x8] sm:$0xff] %v263_v46  ;;  %1005 = vmatmul.mubr.f32.vlgmr.msra.gmra.mrb[2].mxu0 %v263_v46  ;;  %v336_v47 = vmul.f32 0.5, %v263_v46 }
 0x235   :  { %1280 = vmatpush3.bf16.msra.mxu0 %v1638_v5  ;;  %1074 = vmatprep.mubr.msk.f32.mxu0 %vm1533_vm0, %v1534_v1 }
 0x236   :  { %1281 = vmatprep.subr.bf16.mxu0 %v1532_v0  ;;  %v339_v50 = vadd.f32 %v338_v48, %v336_v47 }
 0x239   :  { %1283 = vmatpush3.bf16.msra.mxu0 %v1641_v7 }
 0x23a   :  { %1284 = vmatprep.subr.bf16.mxu0 %v1532_v0 }
 0x23d   :  { %1286 = vmatpush3.bf16.msra.mxu0 %v1647_v10 }
 0x23e   :  { %1287 = vmatprep.subr.bf16.mxu0 %v1532_v0 }
 0x241   :  { %1289 = vmatpush3.bf16.msra.mxu0 %v1653_v13 }
 0x242   :  { %1290 = vmatprep.subr.bf16.mxu0 %v1532_v0 }
 0x245   :  { %1292 = vmatpush3.bf16.msra.mxu0 %v1659_v16 }
 0x246   :  { %1293 = vmatprep.subr.bf16.mxu0 %v1532_v0 }
 0x249   :  { %1295 = vmatpush3.bf16.msra.mxu0 %v1665_v19 }
 0x24a   :  { %1296 = vmatprep.subr.bf16.mxu0 %v1532_v0 }
 0x24d   :  { %1298 = vmatpush3.bf16.msra.mxu0 %v1671_v22 }
 0x24e   :  { %1299 = vmatprep.subr.bf16.mxu0 %v1532_v0 }
 0x251   :  { %1301 = vmatpush3.bf16.msra.mxu0 %v1677_v25 }
 0x252   :  { %1326 = vmatprep.subr.bf16.mxu0 %v1532_v0 }
 0x307   :  { %v332_v49 = vpop.f32.mrb[2].mxu0 }
 0x308   :  { %v340_v51 = vmul.f32 %v332_v49, %v1704_v29  ;;  %v1006_v52 = vpop.f32.mrb[3].mxu0 }
 0x30a   :  { %v341_v53 = vadd.f32 %v340_v51, %v339_v50 }
 0x30c   :  { %v342_v54 = vadd.f32 %v341_v53, %v1707_v34 }
 0x30e   :  { %v343_v55 = vmax.f32 %v342_v54, 0.0 }
 0x310   :  { %345 = vst [vmem:[#allocation12 + $0x10] sm:$0xff] %v343_v55  ;;  %1040 = vmatmul.mubr.f32.vlgmr.msra.gmra.mrb[2].mxu1 %v343_v55  ;;  %v416_v56 = vmul.f32 0.5, %v343_v55 }
 0x311   :  { %1304 = vmatpush3.bf16.msra.mxu1 %v1638_v5  ;;  %1109 = vmatprep.mubr.msk.f32.mxu1 %vm1533_vm0, %v1534_v1 }
 0x312   :  { %1305 = vmatprep.subr.bf16.mxu1 %v1532_v0  ;;  %v419_v59 = vadd.f32 %v418_v57, %v416_v56 }
 0x315   :  { %1307 = vmatpush3.bf16.msra.mxu1 %v1641_v7 }
 0x316   :  { %1308 = vmatprep.subr.bf16.mxu1 %v1532_v0 }
 0x319   :  { %1310 = vmatpush3.bf16.msra.mxu1 %v1647_v10 }
 0x31a   :  { %1311 = vmatprep.subr.bf16.mxu1 %v1532_v0 }
 0x31d   :  { %1313 = vmatpush3.bf16.msra.mxu1 %v1653_v13 }
 0x31e   :  { %1314 = vmatprep.subr.bf16.mxu1 %v1532_v0 }
 0x321   :  { %1316 = vmatpush3.bf16.msra.mxu1 %v1659_v16 }
 0x322   :  { %1317 = vmatprep.subr.bf16.mxu1 %v1532_v0 }
 0x325   :  { %1319 = vmatpush3.bf16.msra.mxu1 %v1665_v19 }
 0x326   :  { %1320 = vmatprep.subr.bf16.mxu1 %v1532_v0 }
 0x329   :  { %1322 = vmatpush3.bf16.msra.mxu1 %v1671_v22 }
 0x32a   :  { %1323 = vmatprep.subr.bf16.mxu1 %v1532_v0 }
 0x32d   :  { %1325 = vmatpush3.bf16.msra.mxu1 %v1677_v25 }
 0x32e   :  { %1350 = vmatprep.subr.bf16.mxu1 %v1532_v0 }
 0x3e3   :  { %v412_v58 = vpop.f32.mrb[2].mxu1 }
 0x3e4   :  { %v420_v60 = vmul.f32 %v412_v58, %v1704_v29  ;;  %v1041_v61 = vpop.f32.mrb[3].mxu1 }
 0x3e6   :  { %v421_v62 = vadd.f32 %v420_v60, %v419_v59 }
 0x3e8   :  { %v422_v63 = vadd.f32 %v421_v62, %v1707_v34 }
 0x3ea   :  { %v423_v2 = vmax.f32 %v422_v63, 0.0 }
 0x3ec   :  { %425 = vst [vmem:[#allocation12 + $0x18] sm:$0xff] %v423_v2  ;;  %1075 = vmatmul.mubr.f32.vlgmr.msra.gmra.mrb[4].mxu0 %v423_v2  ;;  %v496_v3 = vmul.f32 0.5, %v423_v2 }
 0x3ed   :  { %1328 = vmatpush3.bf16.msra.mxu0 %v1638_v5  ;;  %1144 = vmatprep.mubr.msk.f32.mxu0 %vm1533_vm0, %v1534_v1 }
 0x3ee   :  { %1329 = vmatprep.subr.bf16.mxu0 %v1532_v0  ;;  %v499_v8 = vadd.f32 %v498_v4, %v496_v3 }
 0x3f1   :  { %1331 = vmatpush3.bf16.msra.mxu0 %v1641_v7 }
 0x3f2   :  { %1332 = vmatprep.subr.bf16.mxu0 %v1532_v0 }
 0x3f5   :  { %1334 = vmatpush3.bf16.msra.mxu0 %v1647_v10 }
 0x3f6   :  { %1335 = vmatprep.subr.bf16.mxu0 %v1532_v0 }
 0x3f9   :  { %1337 = vmatpush3.bf16.msra.mxu0 %v1653_v13 }
 0x3fa   :  { %1338 = vmatprep.subr.bf16.mxu0 %v1532_v0 }
 0x3fd   :  { %1340 = vmatpush3.bf16.msra.mxu0 %v1659_v16 }
 0x3fe   :  { %1341 = vmatprep.subr.bf16.mxu0 %v1532_v0 }
 0x401   :  { %1343 = vmatpush3.bf16.msra.mxu0 %v1665_v19 }
 0x402   :  { %1344 = vmatprep.subr.bf16.mxu0 %v1532_v0 }
 0x405   :  { %1346 = vmatpush3.bf16.msra.mxu0 %v1671_v22 }
 0x406   :  { %1347 = vmatprep.subr.bf16.mxu0 %v1532_v0 }
 0x409   :  { %1349 = vmatpush3.bf16.msra.mxu0 %v1677_v25 }
 0x4bf   :  { %v492_v6 = vpop.f32.mrb[4].mxu0 }
 0x4c0   :  { %v500_v9 = vmul.f32 %v492_v6, %v1704_v29  ;;  %v1076_v11 = vpop.f32.mrb[5].mxu0 }
 0x4c2   :  { %v501_v12 = vadd.f32 %v500_v9, %v499_v8 }
 0x4c4   :  { %v502_v14 = vadd.f32 %v501_v12, %v1707_v34 }
 0x4c6   :  { %v503_v15 = vmax.f32 %v502_v14, 0.0 }
 0x4c8   :  { %505 = vst [vmem:[#allocation12 + $0x20] sm:$0xff] %v503_v15  ;;  %1110 = vmatmul.mubr.f32.vlgmr.msra.gmra.mrb[4].mxu1 %v503_v15 }
 0x4c9   :  { %1352 = vmatpush3.bf16.msra.mxu1 %v1638_v5  ;;  %1179 = vmatprep.mubr.msk.f32.mxu1 %vm1533_vm0, %v1534_v1  ;;  %v576_v1 = vmul.f32 0.5, %v503_v15  ;;  %v578_v5 = vld [vmem:[#allocation3 + $0x28] sm:$0xff] }
 0x4ca   :  { %1353 = vmatprep.subr.bf16.mxu1 %v1532_v0 }
 0x4cd   :  { %1355 = vmatpush3.bf16.msra.mxu1 %v1641_v7 }
 0x4ce   :  { %1356 = vmatprep.subr.bf16.mxu1 %v1532_v0 }
 0x4d1   :  { %1358 = vmatpush3.bf16.msra.mxu1 %v1647_v10  ;;  %v579_v10 = vadd.f32 %v578_v5, %v576_v1 }
 0x4d2   :  { %1359 = vmatprep.subr.bf16.mxu1 %v1532_v0 }
 0x4d5   :  { %1361 = vmatpush3.bf16.msra.mxu1 %v1653_v13 }
 0x4d6   :  { %1362 = vmatprep.subr.bf16.mxu1 %v1532_v0 }
 0x4d9   :  { %1364 = vmatpush3.bf16.msra.mxu1 %v1659_v16 }
 0x4da   :  { %1365 = vmatprep.subr.bf16.mxu1 %v1532_v0 }
 0x4dd   :  { %1367 = vmatpush3.bf16.msra.mxu1 %v1665_v19 }
 0x4de   :  { %1368 = vmatprep.subr.bf16.mxu1 %v1532_v0 }
 0x4e1   :  { %1370 = vmatpush3.bf16.msra.mxu1 %v1671_v22 }
 0x4e2   :  { %1371 = vmatprep.subr.bf16.mxu1 %v1532_v0 }
 0x4e5   :  { %1373 = vmatpush3.bf16.msra.mxu1 %v1677_v25 }
 0x59b   :  { %v572_v7 = vpop.f32.mrb[4].mxu1 }
 0x59c   :  { %v580_v13 = vmul.f32 %v572_v7, %v1704_v29  ;;  %v1111_v17 = vpop.f32.mrb[5].mxu1 }
 0x59e   :  { %v581_v16 = vadd.f32 %v580_v13, %v579_v10 }
 0x5a0   :  { %v582_v18 = vadd.f32 %v581_v16, %v1707_v34 }
 0x5a2   :  { %v583_v20 = vmax.f32 %v582_v18, 0.0 }
 0x5a4   :  { %585 = vst [vmem:[#allocation12 + $0x28] sm:$0xff] %v583_v20  ;;  %1145 = vmatmul.mubr.f32.vlgmr.msra.gmra.mrb[6].mxu0 %v583_v20  ;;  %v656_v19 = vmul.f32 0.5, %v583_v20 }
 0x5a6   :  { %v659_v23 = vadd.f32 %v658_v21, %v656_v19 }
 0x677   :  { %v652_v22 = vpop.f32.mrb[6].mxu0 }
 0x678   :  { %v660_v0 = vmul.f32 %v652_v22, %v1704_v29  ;;  %v1146_v24 = vpop.f32.mrb[7].mxu0 }
 0x67a   :  { %v661_v25 = vadd.f32 %v660_v0, %v659_v23 }
 0x67c   :  { %v662_v26 = vadd.f32 %v661_v25, %v1707_v34 }
 0x67e   :  { %v663_v27 = vmax.f32 %v662_v26, 0.0 }
 0x680   :  { %665 = vst [vmem:[#allocation12 + $0x30] sm:$0xff] %v663_v27  ;;  %1180 = vmatmul.mubr.f32.vlgmr.msra.gmra.mrb[6].mxu1 %v663_v27  ;;  %v736_v28 = vmul.f32 0.5, %v663_v27 }
 0x682   :  { %v739_v32 = vadd.f32 %v738_v30, %v736_v28 }
 0x753   :  { %v732_v31 = vpop.f32.mrb[6].mxu1 }
 0x754   :  { %v740_v33 = vmul.f32 %v732_v31, %v1704_v29  ;;  %v1181_v35 = vpop.f32.mrb[7].mxu1 }
 0x756   :  { %v741_v36 = vadd.f32 %v740_v33, %v739_v32 }
 0x758   :  { %v742_v37 = vadd.f32 %v741_v36, %v1707_v34 }
 0x75a   :  { %v743_v38 = vmax.f32 %v742_v37, 0.0 }
 0x75c   :  { %745 = vst [vmem:[#allocation12 + $0x38] sm:$0xff] %v743_v38 }
 0x75d   :  { %1506 = shalt.err (!%p1503_p2)
}
 0x75e   :  { %s1507_s30 = scalar_lea.hbm %s1832_s5, 1024 }
 0x75f   :  { %p1508_p3 = scmp.ne.s32.totalorder %s1832_s5, %s1507_s30  ;;  %p1511_p4 = scmp.lt.u32.totalorder %s1507_s30, %s1832_s5 }
 0x761   :  { %p1513_p5 = pnand %p1511_p4, %p1508_p3 }
 0x763   :  { %1516 = shalt.err (!%p1513_p5)
}
 0x764   :  { %758 = dma.vmem_to_hbm [thread:$0]  %s753_s27, 1024, %s1832_s5, [#allocation5], %s1528_s16, %s1528_s16, %s1529_s17  }
 0x765   :  { %1523 = dma.done.wait [#allocation5], 1024  }
 0x766   :  { %1524 = vsyncadd [#allocation5], 4294966272 }
 0x767   :  { %762 = vsyncpa [#allocation4], 1 }
 0x768   :  { %763 = vsyncpa [#allocation7], 1 }
 0x769   :  { %764 = vsyncpa [#allocation10], 1 }
 0x76a   :  { %765 = vsyncpa [#allocation5], 1 }

</bundles_post_ra>
